<compile_context>
chip_gen: v6e
topology: v6e:2x2x1
jax: 0.10.0
libtpu: 0.0.40
codegen_flags: <defaults>
</compile_context>

<pallas_src>
import functools

import jax
import jax.numpy as jnp
from jax.experimental import pallas as pl
from jax.experimental.pallas import tpu as pltpu

_LANE = 128


def _round_up(a: int, b: int) -> int:
    return ((a + b - 1) // b) * b


def _sublane_multiple(dtype) -> int:
    # Sub-32-bit dtypes pack along sublanes: f32 -> 8, bf16 -> 16, int8 -> 32.
    itemsize = jnp.dtype(dtype).itemsize
    return max(8, 32 // max(1, itemsize))


def _add_dims_kernel(x_ref, o_ref, *, dims, value):
    # Copy x into the trailing D lanes, fill the first `dims` lanes with value.
    # Two slice stores (no in-kernel concat): the wide store dominates, and this
    # pattern lowers robustly for arbitrary (non-128-aligned) `dims`/`D`.
    o_ref[:, dims:] = x_ref[...]
    o_ref[:, :dims] = jnp.full((o_ref.shape[0], dims), value, dtype=o_ref.dtype)


def _vmem_budgets():
    """Returns (physical VMEM bytes, pipeline-buffer budget bytes) for this chip."""
    try:
        phys = int(pltpu.get_tpu_info().vmem_capacity_bytes)
    except Exception:
        phys = 64 << 20  # conservative fallback: v7x physical VMEM per TensorCore
    # ~32 MiB of pipeline buffers on v5e/v6e (128 MiB physical), ~16 MiB on v7x
    # (64 MiB physical); we raise vmem_limit_bytes accordingly below.
    budget = min(phys // 4, 32 << 20)
    return phys, budget


def add_dims_to_start(x, dims, value, *, vmem_budget_bytes=None):
    """Pallas equivalent of AddDimsToStartModule(dims, value).forward(x)."""
    if x.ndim < 1:
        raise ValueError("add_dims_to_start expects an input with at least 1 dim")
    if dims < 0:
        raise ValueError(f"dims must be non-negative, got {dims}")

    orig_shape = x.shape
    d = orig_shape[-1]
    p = dims + d
    lead = orig_shape[:-1]

    # Mirror torch.full's strict-cast behavior: a non-integral fill value for an
    # integer/bool dtype is an error rather than a silent truncation.
    if not jnp.issubdtype(x.dtype, jnp.inexact):
        if float(value) != int(value):
            raise TypeError(
                f"value={value!r} cannot be represented exactly in dtype {x.dtype}")

    r = 1
    for s in lead:
        r *= s

    # Degenerate shapes: zero-sized blocks / zero-width slice stores do not
    # lower cleanly, and there is no data movement worth a kernel here.
    if dims == 0:
        return x
    if r == 0 or d == 0:
        fill = jnp.full(lead + (dims,), value, dtype=x.dtype)
        return jnp.concatenate([fill, x], axis=-1)

    x2 = x.reshape(r, d)
    itemsize = jnp.dtype(x.dtype).itemsize
    sub = _sublane_multiple(x.dtype)

    phys_vmem, auto_budget = _vmem_budgets()
    budget = auto_budget if vmem_budget_bytes is None else int(vmem_budget_bytes)

    # Padded VMEM footprint per row: the lane (last) dim of each block is padded
    # to a multiple of 128 in VMEM, and the pipeline double-buffers input and
    # output tiles.  (Counting logical bytes under-counts by up to 8x for
    # narrow D and would blow the scoped-VMEM limit once tiles grow.)
    d_pad = _round_up(d, _LANE)
    p_pad = _round_up(p, _LANE)
    bytes_per_row = (d_pad + p_pad) * itemsize * 2  # in + out, double-buffered

    cap_rows = budget // bytes_per_row
    # For absurdly wide D even `sub` rows may exceed the budget; we still need a
    # valid block, so clamp up (the vmem_limit below grows to match, capped by
    # physical VMEM).
    cap_rows = max(sub, (cap_rows // sub) * sub)

    if r <= cap_rows:
        # Whole problem fits in one tile.  Still emit >= 2 grid steps whenever
        # the rows can be split at sublane granularity so the "parallel" grid
        # axis actually uses both TensorCores on v7x.
        if r >= 2 * sub:
            tile_r = min(cap_rows, _round_up(pl.cdiv(r, 2), sub))
        else:
            tile_r = r  # full-extent block: no (8,128) divisibility required
    else:
        tile_r = cap_rows  # multiple of the sublane packing -> valid block shape

    grid = (pl.cdiv(r, tile_r),)

    used_vmem = 2 * tile_r * (d_pad + p_pad) * itemsize
    vmem_limit = int(min(phys_vmem, max(32 << 20, used_vmem + (8 << 20))))

    out2 = pl.pallas_call(
        functools.partial(_add_dims_kernel, dims=dims, value=value),
        out_shape=jax.ShapeDtypeStruct((r, p), x.dtype),
        grid=grid,
        in_specs=[pl.BlockSpec((tile_r, d), lambda i: (i, 0))],
        out_specs=pl.BlockSpec((tile_r, p), lambda i: (i, 0)),
        compiler_params=pltpu.CompilerParams(
            # Independent row tiles -> shard across both TCs on v7x megacore.
            dimension_semantics=("parallel",),
            vmem_limit_bytes=vmem_limit,
        ),
        cost_estimate=pl.CostEstimate(
            flops=0,
            transcendentals=0,
            bytes_accessed=r * d * itemsize + r * p * itemsize,
        ),
    )(x2)

    return out2.reshape(lead + (p,))


def _reference(x, dims, value):
    fill = jnp.full(x.shape[:-1] + (dims,), value, dtype=x.dtype)
    return jnp.concatenate([fill, x], axis=-1)


if __name__ == "__main__":
    # Module "parameters" (constructor args) -- deterministic, in-script.
    DIMS = 4
    VALUE = 0.5

    key = jax.random.PRNGKey(0)

    # 1) Main example: generic (..., D) tensor.  r=128 rows -> 2 grid steps
    #    (megacore-friendly), D=16 features.
    x = jax.random.normal(key, (2, 4, 16, 16), dtype=jnp.float32)
    out = jax.block_until_ready(add_dims_to_start(x, DIMS, VALUE))
    ref = _reference(x, DIMS, VALUE)
    assert out.shape == ref.shape, (out.shape, ref.shape)
    assert out.dtype == ref.dtype, (out.dtype, ref.dtype)
    assert jnp.array_equal(out, ref), "mismatch vs reference (main path)"

    # 2) Multi-step tiled grid with a partial last row-block, forced via a tiny
    #    VMEM budget (120 rows, 32-row tiles -> 4 steps, last one partial).
    x2 = jax.random.normal(jax.random.PRNGKey(1), (3, 40, 16), dtype=jnp.float32)
    out2 = jax.block_until_ready(
        add_dims_to_start(x2, DIMS, VALUE, vmem_budget_bytes=64 * 1024))
    ref2 = _reference(x2, DIMS, VALUE)
    assert out2.shape == ref2.shape, (out2.shape, ref2.shape)
    assert jnp.array_equal(out2, ref2), "mismatch vs reference (tiled path)"

    # 3) Sub-32-bit dtype (bf16 packs 16 rows per sublane group).
    x3 = jax.random.normal(jax.random.PRNGKey(2), (2, 32, 24), dtype=jnp.bfloat16)
    out3 = jax.block_until_ready(add_dims_to_start(x3, DIMS, VALUE))
    ref3 = _reference(x3, DIMS, VALUE)
    assert out3.shape == ref3.shape, (out3.shape, ref3.shape)
    assert out3.dtype == ref3.dtype
    assert jnp.array_equal(out3, ref3), "mismatch vs reference (bf16 path)"

    # 4) Degenerate shapes go through the guarded fallbacks.
    x4 = jnp.zeros((4, 0, 8), dtype=jnp.float32)
    out4 = add_dims_to_start(x4, DIMS, VALUE)
    assert out4.shape == (4, 0, 8 + DIMS)
    assert jnp.array_equal(add_dims_to_start(x, 0, VALUE), x)

    print("KERNEL_OK")
</pallas_src>

<mosaic_0001>
module attributes {stable_mosaic.version = 11 : i64} {
  func.func @_add_dims_kernel(%arg0: i32, %arg1: memref<64x16xf32, #tpu.memory_space<vmem>>, %arg2: memref<64x20xf32, #tpu.memory_space<vmem>>) attributes {dimension_semantics = [#tpu.dimension_semantics<parallel>], iteration_bounds = array<i64: 2>, scalar_prefetch = 0 : i64, scratch_operands = 0 : i64, tpu.core_type = #tpu.core_type<tc>, window_params = [{transform_indices = @transform_0, window_bounds = array<i64: 64, 16>}, {transform_indices = @transform_1, window_bounds = array<i64: 64, 20>}]} {
    %c0 = arith.constant 0 : index
    %c0_0 = arith.constant 0 : index
    %0 = vector.load %arg1[%c0, %c0_0] : memref<64x16xf32, #tpu.memory_space<vmem>>, vector<64x16xf32>
    %c0_1 = arith.constant 0 : index
    %c4 = arith.constant 4 : index
    %1 = vector.load %arg2[%c0_1, %c4] : memref<64x20xf32, #tpu.memory_space<vmem>>, vector<64x16xf32>
    tpu.vector_store %arg2[%c0_1, %c4], %0 {strides = array<i32>} : memref<64x20xf32, #tpu.memory_space<vmem>>, vector<64x16xf32>,
    %cst = arith.constant 5.000000e-01 : f32
    %2 = vector.broadcast %cst : f32 to vector<64x4xf32>
    %c0_2 = arith.constant 0 : index
    %c0_3 = arith.constant 0 : index
    %3 = vector.load %arg2[%c0_2, %c0_3] : memref<64x20xf32, #tpu.memory_space<vmem>>, vector<64x4xf32>
    tpu.vector_store %arg2[%c0_2, %c0_3], %2 {strides = array<i32>} : memref<64x20xf32, #tpu.memory_space<vmem>>, vector<64x4xf32>,
    return
  }
  func.func @transform_0(%arg0: i32) -> (i32, i32) {
    %c0_i32 = arith.constant 0 : i32
    %c0_i32_0 = arith.constant 0 : i32
    return %arg0, %c0_i32 : i32, i32
  }
  func.func @transform_1(%arg0: i32) -> (i32, i32) {
    %c0_i32 = arith.constant 0 : i32
    %c0_i32_0 = arith.constant 0 : i32
    return %arg0, %c0_i32 : i32, i32
  }
}

</mosaic_0001>

<bundles_post_ra>
// kernel: tpu_custom_call.1
= control target key start
LH: loop header
LB: loop body
LE: loop exit
PB: predicated region body
PF: predicated region fallthrough
CT: control target
= control target key end

     0   :  { %s275_s6 = smov 0   ;;  %s308_s0 = inlined_call_operand.vmem [shape: f32[128,16], index: 0, kind: input, shape index: {}]   ;;  %s309_s1 = inlined_call_operand.vmem [shape: f32[128,20], index: 1, kind: output, shape index: {}]  }
   0x1 LB: > { %s234_s7 = sadd.s32 4294967295, %s261_s6   ;;  %p238_p0 = scmp.ge.s32.totalorder %s261_s6, 1  ;;  %s261_s6 = sphi %s275_s6, %s11_s6  }
   0x2   : > { %p88_p1 = scmp.lt.s32.totalorder %s261_s6, 3 }
   0x4   : > { %p89_p2 = pnand %p238_p0, %p88_p1 }
   0x5   : > { %s239_s8 = sshll.u32 (!%p89_p2), %s234_s7, 3  ;;  %s263_s13 = smov (!%p89_p2), 4  }
   0x6   : > { %92 = sbr.rel (%p89_p2) target bundleno = 144 (0x90), region = 24  ;;  %p109_p3 = scmp.lt.s32.totalorder (!%p89_p2), %s239_s8, 15 }
   0xb   : > { %s311_s8 = smov (!%p109_p3, %s239_s8), 15  ;;  %vm160_vm0 = vcmask 162848   ;;  %vm169_vm1 = vcmask 31744   ;;  %v264_v10 = vmov 0.5  }
   0xc   : > { %s240_s9 = sshll.u32 %s311_s8, 3 }
   0xd   : > { %s112_s12 = scalar_lea.vmem %s308_s0, %s240_s9  ;;  %s118_s16 = scalar_lea.vmem %s309_s1, %s240_s9 }
   0xe   : > { %v122_v0 = vld [vmem:[%s112_s12 + $0x10] sm:$0xff]  ;;  %v120_v1 = vld [vmem:[%s112_s12] sm:$0xff]  ;;  %v123_v2 = vld [vmem:[%s112_s12 + $0x18] sm:$0xff] }
   0xf   : > { %140 = vrot.lane.b32.xlu1 %v122_v0, %s263_s13  ;;  %136 = vrot.lane.b32.xlu0 %v120_v1, %s263_s13  ;;  %v121_v3 = vld [vmem:[%s112_s12 + $0x8] sm:$0xff]  ;;  %v124_v5 = vld [vmem:[%s112_s12 + $0x20] sm:$0xff] }
  0x10   : > { %v125_v4 = vld [vmem:[%s112_s12 + $0x28] sm:$0xff]  ;;  %v127_v6 = vld [vmem:[%s112_s12 + $0x38] sm:$0xff]  ;;  %v126_v7 = vld [vmem:[%s112_s12 + $0x30] sm:$0xff] }
  0x13   : > { %142 = vrot.lane.b32.xlu1 %v123_v2, %s263_s13  ;;  %138 = vrot.lane.b32.xlu0 %v121_v3, %s263_s13 }
  0x17   : > { %146 = vrot.lane.b32.xlu1 %v125_v4, %s263_s13  ;;  %144 = vrot.lane.b32.xlu0 %v124_v5, %s263_s13 }
  0x1b   : > { %150 = vrot.lane.b32.xlu1 %v127_v6, %s263_s13  ;;  %148 = vrot.lane.b32.xlu0 %v126_v7, %s263_s13 }
  0x81   : > { %v141_v8 = vpop.permute.xlu1 %140  ;;  %v137_v9 = vpop.permute.xlu0 %136 }
  0x82   : > { %163 = vst.msk [vmem:[%s118_s16 + $0x10] sm:$0xff] %vm160_vm0, %v141_v8  ;;  %161 = vst.msk [vmem:[%s118_s16] sm:$0xff] %vm160_vm0, %v137_v9 }
  0x83   : > { %172 = vst.msk [vmem:[%s118_s16 + $0x10] sm:$0xff] %vm169_vm1, %v264_v10  ;;  %170 = vst.msk [vmem:[%s118_s16] sm:$0xff] %vm169_vm1, %v264_v10 }
  0x85   : > { %v143_v11 = vpop.permute.xlu1 %142  ;;  %v139_v12 = vpop.permute.xlu0 %138 }
  0x86   : > { %164 = vst.msk [vmem:[%s118_s16 + $0x18] sm:$0xff] %vm160_vm0, %v143_v11  ;;  %162 = vst.msk [vmem:[%s118_s16 + $0x8] sm:$0xff] %vm160_vm0, %v139_v12 }
  0x87   : > { %173 = vst.msk [vmem:[%s118_s16 + $0x18] sm:$0xff] %vm169_vm1, %v264_v10  ;;  %171 = vst.msk [vmem:[%s118_s16 + $0x8] sm:$0xff] %vm169_vm1, %v264_v10 }
  0x89   : > { %v147_v13 = vpop.permute.xlu1 %146  ;;  %v145_v14 = vpop.permute.xlu0 %144 }
  0x8a   : > { %166 = vst.msk [vmem:[%s118_s16 + $0x28] sm:$0xff] %vm160_vm0, %v147_v13  ;;  %165 = vst.msk [vmem:[%s118_s16 + $0x20] sm:$0xff] %vm160_vm0, %v145_v14 }
  0x8b   : > { %175 = vst.msk [vmem:[%s118_s16 + $0x28] sm:$0xff] %vm169_vm1, %v264_v10  ;;  %174 = vst.msk [vmem:[%s118_s16 + $0x20] sm:$0xff] %vm169_vm1, %v264_v10 }
  0x8d   : > { %v151_v15 = vpop.permute.xlu1 %150  ;;  %v149_v16 = vpop.permute.xlu0 %148 }
  0x8e   : > { %168 = vst.msk [vmem:[%s118_s16 + $0x38] sm:$0xff] %vm160_vm0, %v151_v15  ;;  %167 = vst.msk [vmem:[%s118_s16 + $0x30] sm:$0xff] %vm160_vm0, %v149_v16 }
  0x8f   : > { %177 = vst.msk [vmem:[%s118_s16 + $0x38] sm:$0xff] %vm169_vm1, %v264_v10  ;;  %176 = vst.msk [vmem:[%s118_s16 + $0x30] sm:$0xff] %vm169_vm1, %v264_v10 }
  0x90 PF: > { %s11_s6 = sadd.s32 1, %s261_s6  }
  0x91   : > { %p8_p4 = scmp.ge.s32.totalorder %s11_s6, 4  }
  0x93   :  { %10 = sbr.rel (!%p8_p4) target bundleno = 1 (0x1), region = 54 }

</bundles_post_ra>
